<compile_context>
chip_gen: v6e
topology: v6e:2x2x1
jax: 0.10.0
libtpu: 0.0.40
codegen_flags: <defaults>
</compile_context>

<pallas_src>
import functools

import jax
import jax.numpy as jnp
from jax.experimental import pallas as pl
from jax.experimental.pallas import tpu as pltpu

N_STEPS = 50
# Batch tile: multiple of 8 sublanes, large enough to amortize the ~0.35us
# per-grid-step overhead, small enough for every generation's VMEM budget.
DEFAULT_BLOCK_BATCH = 1024


def _dense_kernel(x_ref, w_ref, b_ref, o_ref):
    # x_ref: (TB, N_STEPS) VMEM   w_ref: (1, N_STEPS) VMEM (grid-resident)
    # b_ref: (1, 1) SMEM          o_ref: (TB, 1) VMEM
    x = x_ref[...]
    w = w_ref[...]                      # broadcasts over the TB sublanes
    b = b_ref[0, 0]                     # scalar read from SMEM
    # VPU multiply + XLU lane reduction; avoids MXU push/drain for an N=1 GEMV.
    y = jnp.sum(x * w, axis=-1, keepdims=True) + b
    o_ref[...] = y.astype(o_ref.dtype)


@functools.partial(jax.jit, static_argnames=("block_batch",))
def fully_connected_forward(x, weight, bias, *, block_batch=DEFAULT_BLOCK_BATCH):
    """y = flatten(x) @ weight.T + bias, computed in a Pallas TPU kernel.

    x:      (batch, N_STEPS, 1) float32  (trailing dims flatten to N_STEPS)
    weight: (1, N_STEPS)        float32  (PyTorch nn.Linear layout)
    bias:   (1,)                float32
    returns (batch, 1)          float32
    """
    batch = x.shape[0]
    x_flat = x.reshape(batch, -1).astype(jnp.float32)          # (B, N_STEPS)
    assert x_flat.shape[1] == N_STEPS, "flattened features must equal N_STEPS"

    w2d = weight.reshape(1, N_STEPS).astype(jnp.float32)        # no transpose needed
    b2d = bias.reshape(1, 1).astype(jnp.float32)                # scalar -> SMEM

    # Batch tile: multiple of 8 (sublane granularity); pad ragged batches.
    tb = min(block_batch, max(batch, 8))
    tb = ((tb + 7) // 8) * 8
    padded_batch = pl.cdiv(batch, tb) * tb
    if padded_batch != batch:
        x_flat = jnp.pad(x_flat, ((0, padded_batch - batch), (0, 0)))

    grid = (padded_batch // tb,)

    out = pl.pallas_call(
        _dense_kernel,
        out_shape=jax.ShapeDtypeStruct((padded_batch, 1), jnp.float32),
        grid_spec=pltpu.PrefetchScalarGridSpec(
            num_scalar_prefetch=0,
            grid=grid,
            in_specs=[
                # x: one batch tile per grid step (pipelined HBM->VMEM DMA).
                pl.BlockSpec((tb, N_STEPS), lambda i: (i, 0)),
                # weight: constant index_map -> resident in VMEM for whole grid.
                pl.BlockSpec((1, N_STEPS), lambda i: (0, 0)),
                # bias: 4 bytes -> SMEM, not a double-buffered VMEM block.
                pl.BlockSpec(memory_space=pltpu.MemorySpace.SMEM),
            ],
            out_specs=pl.BlockSpec((tb, 1), lambda i: (i, 0)),
        ),
        compiler_params=pltpu.CompilerParams(
            # Batch tiles are independent -> megacore sharding on v7x; harmless on v5e/v6e.
            dimension_semantics=("parallel",),
            # Explicit scoped-VMEM budget; usage is ~2-3 MiB, limit safe on all gens.
            vmem_limit_bytes=32 * 1024 * 1024,
        ),
    )(x_flat, w2d, b2d)

    if padded_batch != batch:
        out = out[:batch]
    return out


if __name__ == "__main__":
    key = jax.random.PRNGKey(0)
    k_x, k_w, k_b = jax.random.split(key, 3)

    # Deterministic parameter init mimicking nn.Linear default:
    # U(-1/sqrt(in_features), 1/sqrt(in_features)).
    bound = 1.0 / jnp.sqrt(jnp.float32(N_STEPS))
    weight = jax.random.uniform(
        k_w, (1, N_STEPS), minval=-bound, maxval=bound, dtype=jnp.float32
    )
    bias = jax.random.uniform(
        k_b, (1,), minval=-bound, maxval=bound, dtype=jnp.float32
    )

    # Small demo consistent with the module: (batch, N_STEPS, 1).
    batch = 8
    x = jax.random.normal(k_x, (batch, N_STEPS, 1), dtype=jnp.float32)

    y = jax.block_until_ready(fully_connected_forward(x, weight, bias))
    y_ref = x.reshape(batch, -1) @ weight.T + bias
    assert y.shape == (batch, 1)
    assert jnp.allclose(y, y_ref, atol=1e-5, rtol=1e-5)

    # Exercise the tiled / padded path (multi-step grid, ragged batch).
    batch2 = 1030
    x2 = jax.random.normal(k_x, (batch2, N_STEPS, 1), dtype=jnp.float32)
    y2 = jax.block_until_ready(
        fully_connected_forward(x2, weight, bias, block_batch=512)
    )
    y2_ref = x2.reshape(batch2, -1) @ weight.T + bias
    assert y2.shape == (batch2, 1)
    assert jnp.allclose(y2, y2_ref, atol=1e-5, rtol=1e-5)

    print("KERNEL_OK")
</pallas_src>

<mosaic_0001>
module attributes {stable_mosaic.version = 11 : i64} {
  func.func @_dense_kernel(%arg0: i32, %arg1: memref<8x50xf32, #tpu.memory_space<vmem>>, %arg2: memref<1x50xf32, #tpu.memory_space<vmem>>, %arg3: memref<1x1xf32, #tpu.memory_space<smem>>, %arg4: memref<8x1xf32, #tpu.memory_space<vmem>>) attributes {dimension_semantics = [#tpu.dimension_semantics<parallel>], iteration_bounds = array<i64: 1>, scalar_prefetch = 0 : i64, scratch_operands = 0 : i64, tpu.core_type = #tpu.core_type<tc>, window_params = [{transform_indices = @transform_0, window_bounds = array<i64: 8, 50>}, {pipeline_mode = #tpu.pipeline_mode<synchronous>, transform_indices = @transform_1, window_bounds = array<i64: 1, 50>}, {transform_indices = @transform_2, window_bounds = array<i64: 1, 1>}, {transform_indices = @transform_3, window_bounds = array<i64: 8, 1>}]} {
    %c0 = arith.constant 0 : index
    %c0_0 = arith.constant 0 : index
    %0 = vector.load %arg1[%c0, %c0_0] : memref<8x50xf32, #tpu.memory_space<vmem>>, vector<8x50xf32>
    %c0_1 = arith.constant 0 : index
    %c0_2 = arith.constant 0 : index
    %1 = vector.load %arg2[%c0_1, %c0_2] : memref<1x50xf32, #tpu.memory_space<vmem>>, vector<1x50xf32>
    %c0_3 = arith.constant 0 : index
    %c0_4 = arith.constant 0 : index
    %2 = memref.load %arg3[%c0_3, %c0_4] : memref<1x1xf32, #tpu.memory_space<smem>>
    %3 = vector.broadcast %1 : vector<1x50xf32> to vector<8x50xf32>
    %4 = arith.mulf %0, %3 : vector<8x50xf32>
    %cst = arith.constant dense<0.000000e+00> : vector<8xf32>
    %5 = vector.multi_reduction <add>, %4, %cst [1] : vector<8x50xf32> to vector<8xf32>
    %6 = vector.shape_cast %5 : vector<8xf32> to vector<8x1xf32>
    %7 = vector.broadcast %2 : f32 to vector<8x1xf32>
    %8 = arith.addf %6, %7 : vector<8x1xf32>
    %c0_5 = arith.constant 0 : index
    %c0_6 = arith.constant 0 : index
    %9 = vector.load %arg4[%c0_5, %c0_6] : memref<8x1xf32, #tpu.memory_space<vmem>>, vector<8x1xf32>
    tpu.vector_store %arg4[%c0_5, %c0_6], %8 {strides = array<i32>} : memref<8x1xf32, #tpu.memory_space<vmem>>, vector<8x1xf32>,
    return
  }
  func.func @transform_0(%arg0: i32) -> (i32, i32) {
    %c0_i32 = arith.constant 0 : i32
    %c0_i32_0 = arith.constant 0 : i32
    return %arg0, %c0_i32 : i32, i32
  }
  func.func @transform_1(%arg0: i32) -> (i32, i32) {
    %c0_i32 = arith.constant 0 : i32
    %c0_i32_0 = arith.constant 0 : i32
    %c0_i32_1 = arith.constant 0 : i32
    return %c0_i32, %c0_i32_0 : i32, i32
  }
  func.func @transform_2(%arg0: i32) -> (i32, i32) {
    %c0_i32 = arith.constant 0 : i32
    %c0_i32_0 = arith.constant 0 : i32
    %c0_i32_1 = arith.constant 0 : i32
    return %c0_i32, %c0_i32_0 : i32, i32
  }
  func.func @transform_3(%arg0: i32) -> (i32, i32) {
    %c0_i32 = arith.constant 0 : i32
    %c0_i32_0 = arith.constant 0 : i32
    return %arg0, %c0_i32 : i32, i32
  }
}

</mosaic_0001>

<bundles_post_ra>
// kernel: fully_connected_forward.1
= control target key start
LH: loop header
LB: loop body
LE: loop exit
PB: predicated region body
PF: predicated region fallthrough
CT: control target
= control target key end

     0   :  { %9 = vsyncpa [#allocation4], 0  ;;  %s74_s12 = smov [#allocation3]   ;;  %s107_s0 = inlined_call_operand.hbm [shape: f32[8,50], index: 0, kind: input, shape index: {}]   ;;  %s108_s1 = inlined_call_operand.vmem [shape: f32[1,50], index: 1, kind: input, shape index: {}]   ;;  %s109_s2 = inlined_call_operand.<no memory space> [shape: f32[1,1], index: 2, kind: input, shape index: {}]   ;;  %s110_s3 = inlined_call_operand.vmem [shape: f32[8,1], index: 3, kind: output, shape index: {}]  }
   0x1   :  { %s16_s13 = sshll.u32 %s74_s12, 4  ;;  %s17_s13 = int_to_ptr.vmem [resolvable:$true] %s16_s13 }
   0x2   :  { %s60_s14 = scalar_lea.vmem %s17_s13, 128  ;;  %p65_p1 = scmp.lt.s32.totalorder %s17_s13, %s17_s13 }
   0x3   :  { %p61_p0 = scmp.ne.s32.totalorder %s17_s13, %s60_s14  ;;  %p66_p2 = scmp.lt.s32.totalorder %s60_s14, %s60_s14 }
   0x5   :  { %p67_p3 = por %p66_p2, %p65_p1 }
   0x7   :  { %p68_p4 = pnand %p67_p3, %p61_p0 }
   0x9   :  { %71 = shalt.err (!%p68_p4)
}
   0xa   :  { %19 = dma.hbm_to_vmem [thread:$0]  %s107_s0, 128, %s17_s13, [#allocation4]  }
   0xb   :  { %72 = dma.done.wait [#allocation4], 128  }
   0xc   :  { %73 = vsyncadd [#allocation4], 4294967168  ;;  %v27_v0 = vld [vmem:[#allocation3] sm:$0xff]  ;;  %vm37_vm0 = vcmask 408576   ;;  %v41_v4 = vstv %s109_s2  ;;  %vm43_vm1 = vcmask 7168  }
   0xd   :  { %v50_v1 = vld [vmem:[%s108_s1] ss:$0 sm:$0xff] }
   0xe   :  { %v36_v2 = vmul.f32 %v50_v1, %v27_v0 }
  0x10   :  { %v38_v3 = vsel %vm37_vm0, %v36_v2, 0.0 }
  0x11   :  { %39 = vadd.xlane.f32.xlu0 %v38_v3 }
  0x9a   :  { %v40_v5 = vpop.xlane.xlu0 %39 }
  0x9b   :  { %v42_v6 = vadd.f32 %v41_v4, %v40_v5 }
  0x9d   :  { %44 = vst.msk [vmem:[%s110_s3] sm:$0xff] %vm43_vm1, %v42_v6 }
  0x9e   :  { %49 = vsyncpa [#allocation4], 1 }

</bundles_post_ra>
